<compile_context>
chip_gen: v5e
topology: v5e:2x2
jax: 0.10.0
libtpu: 0.0.40
codegen_flags: <defaults>
</compile_context>

<pallas_src>
import functools

import jax
import jax.numpy as jnp
from jax import lax
from jax.experimental import pallas as pl
from jax.experimental.pallas import tpu as pltpu

BN_EPS = 1e-5
_LANE = 128        # lane width (last-dim alignment)
_ROW_ALIGN = 16    # row-tile alignment (bf16 sublane packing = 16 rows)
_TILE_M_MAX = 512  # rows per grid step


def _round_up(x, m):
    return (x + m - 1) // m * m


def _tiling(M):
    """Balanced M tiles: <=512 rows, multiple of 16, >=2 tiles when possible."""
    n_tiles = pl.cdiv(M, _TILE_M_MAX)
    if M >= 2 * _ROW_ALIGN:
        n_tiles = max(n_tiles, 2)      # let v7x shard tiles across its 2 TCs
    tile_m = _round_up(pl.cdiv(M, n_tiles), _ROW_ALIGN)
    n_tiles = pl.cdiv(M, tile_m)
    return tile_m, n_tiles, tile_m * n_tiles


def _vmem_limit_bytes(working_set_bytes):
    need = int(working_set_bytes * 1.5) + (1 << 20)
    return max(32 << 20, min(need, 64 << 20))


# ----------------------------------------------------------------------------
# Pass 1 kernel: one bf16 matmul (K = T*Cin) per M-tile + BN partial statistics
# ----------------------------------------------------------------------------
def _conv_stats_kernel(p_ref, w_ref, out_ref, stats_ref):
    # Single MXU matmul with the full contraction K = T*Cin (padded to 128).
    acc = jnp.dot(p_ref[...], w_ref[...], preferred_element_type=jnp.float32)

    # Per-channel partial sums on the f32 accumulator (before the bf16 cast).
    stats_ref[...] = jnp.zeros_like(stats_ref)
    stats_ref[0:1, :] = jnp.sum(acc, axis=0, keepdims=True)
    stats_ref[1:2, :] = jnp.sum(acc * acc, axis=0, keepdims=True)

    out_ref[...] = acc.astype(out_ref.dtype)  # bf16 intermediate -> half HBM


# ----------------------------------------------------------------------------
# Pass 2 kernel: y = conv*scale + shift (+ res*rscale + rshift) (+ relu)
# ----------------------------------------------------------------------------
def _bn_act_kernel(x_ref, sc_ref, sh_ref, *rest, relu, add_res):
    if add_res:
        r_ref, rsc_ref, rsh_ref, out_ref = rest
    else:
        (out_ref,) = rest

    y = x_ref[...].astype(jnp.float32) * sc_ref[...] + sh_ref[...]
    if add_res:
        y = y + (r_ref[...].astype(jnp.float32) * rsc_ref[...] + rsh_ref[...])
    if relu:
        y = jnp.maximum(y, 0.0)
    out_ref[...] = y.astype(out_ref.dtype)


# ----------------------------------------------------------------------------
# conv(KxK, stride, pad=(K-1)//2, bias=False) + BN batch-stat reduction.
# Returns the (padded) bf16 conv output plus the folded BN affine (scale,shift).
# ----------------------------------------------------------------------------
def conv_stats(x_nhwc, w_oikk, gamma, beta, *, stride):
    N, H, W, Cin = x_nhwc.shape
    Cout, _, KH, KW = w_oikk.shape
    pad = (KH - 1) // 2
    Ho = (H + 2 * pad - KH) // stride + 1
    Wo = (W + 2 * pad - KW) // stride + 1
    M = N * Ho * Wo
    Kc = KH * KW * Cin

    # ---- glue: im2col patches (M, T*Cin), built directly in bf16 ------------
    x_bf = x_nhwc.astype(jnp.bfloat16)
    xp = jnp.pad(x_bf, ((0, 0), (pad, pad), (pad, pad), (0, 0)))
    cols = []
    for ky in range(KH):
        for kx in range(KW):
            sl = lax.slice(
                xp,
                (0, ky, kx, 0),
                (N, ky + (Ho - 1) * stride + 1, kx + (Wo - 1) * stride + 1, Cin),
                (1, stride, stride, 1),
            )
            cols.append(sl.reshape(M, Cin))
    patches = jnp.concatenate(cols, axis=1)  # column = ((ky*KW + kx)*Cin + c)

    # ---- lane/sublane-friendly padding ---------------------------------------
    Kp = _round_up(Kc, _LANE)
    Cp = _round_up(Cout, _LANE)
    tile_m, n_tiles, Mp = _tiling(M)

    patches_p = jnp.pad(patches, ((0, Mp - M), (0, Kp - Kc)))
    w_mat = jnp.transpose(w_oikk, (2, 3, 1, 0)).reshape(Kc, Cout)
    w_p = jnp.pad(w_mat, ((0, Kp - Kc), (0, Cp - Cout))).astype(jnp.bfloat16)

    vmem = _vmem_limit_bytes(
        2 * tile_m * Kp * 2      # double-buffered bf16 patch tiles
        + 2 * Kp * Cp * 2        # (grid-invariant) bf16 weights
        + 2 * tile_m * Cp * 2    # double-buffered bf16 output tiles
        + 2 * 8 * Cp * 4         # stats partials
    )

    conv_out, stats = pl.pallas_call(
        _conv_stats_kernel,
        out_shape=(
            jax.ShapeDtypeStruct((Mp, Cp), jnp.bfloat16),
            jax.ShapeDtypeStruct((n_tiles * 8, Cp), jnp.float32),
        ),
        grid=(n_tiles,),
        in_specs=[
            pl.BlockSpec((tile_m, Kp), lambda i: (i, 0)),  # patches: tiled over M
            pl.BlockSpec((Kp, Cp), lambda i: (0, 0)),      # weights: grid-invariant
        ],
        out_specs=(
            pl.BlockSpec((tile_m, Cp), lambda i: (i, 0)),
            pl.BlockSpec((8, Cp), lambda i: (i, 0)),
        ),
        compiler_params=pltpu.CompilerParams(
            dimension_semantics=("parallel",), vmem_limit_bytes=vmem),
        cost_estimate=pl.CostEstimate(
            flops=2 * Mp * Kp * Cp,
            transcendentals=0,
            bytes_accessed=Mp * Kp * 2 + Kp * Cp * 2 + Mp * Cp * 2
            + n_tiles * 8 * Cp * 4,
        ),
    )(patches_p, w_p)

    # ---- fold BN into a per-channel affine (training-mode batch stats) -------
    # Padded rows/channels contribute exactly 0 to both sums, so dividing by
    # the true M keeps the statistics exact.
    stats = stats.reshape(n_tiles, 8, Cp)
    s1 = jnp.sum(stats[:, 0, :], axis=0)
    s2 = jnp.sum(stats[:, 1, :], axis=0)
    mean = s1 / M
    var = jnp.maximum(s2 / M - mean * mean, 0.0)  # biased variance
    inv_std = lax.rsqrt(var + BN_EPS)

    gamma_p = jnp.pad(gamma.astype(jnp.float32), (0, Cp - Cout),
                      constant_values=1.0)
    beta_p = jnp.pad(beta.astype(jnp.float32), (0, Cp - Cout))
    scale = (gamma_p * inv_std).reshape(1, Cp)
    shift = (beta_p - mean * gamma_p * inv_std).reshape(1, Cp)

    meta = dict(N=N, Ho=Ho, Wo=Wo, Cout=Cout, M=M, Mp=Mp, Cp=Cp,
                tile_m=tile_m, n_tiles=n_tiles)
    return conv_out, scale, shift, meta


# ----------------------------------------------------------------------------
# Pass 2 wrapper: BN-apply (+ fused residual BN-apply) (+ relu), tiled over M.
# ----------------------------------------------------------------------------
def bn_apply(conv_out, scale, shift, meta, *, relu, residual=None):
    Mp, Cp = meta["Mp"], meta["Cp"]
    tile_m, n_tiles = meta["tile_m"], meta["n_tiles"]
    add_res = residual is not None
    kernel = functools.partial(_bn_act_kernel, relu=relu, add_res=add_res)

    in_specs = [
        pl.BlockSpec((tile_m, Cp), lambda i: (i, 0)),
        pl.BlockSpec((1, Cp), lambda i: (0, 0)),
        pl.BlockSpec((1, Cp), lambda i: (0, 0)),
    ]
    args = [conv_out, scale, shift]
    if add_res:
        r, rsc, rsh = residual
        in_specs += [
            pl.BlockSpec((tile_m, Cp), lambda i: (i, 0)),
            pl.BlockSpec((1, Cp), lambda i: (0, 0)),
            pl.BlockSpec((1, Cp), lambda i: (0, 0)),
        ]
        args += [r, rsc, rsh]

    vmem = _vmem_limit_bytes(
        2 * tile_m * Cp * 2 * (2 + int(add_res)) + 8 * Cp * 4)

    y = pl.pallas_call(
        kernel,
        out_shape=jax.ShapeDtypeStruct((Mp, Cp), jnp.bfloat16),
        grid=(n_tiles,),
        in_specs=in_specs,
        out_specs=pl.BlockSpec((tile_m, Cp), lambda i: (i, 0)),
        compiler_params=pltpu.CompilerParams(
            dimension_semantics=("parallel",), vmem_limit_bytes=vmem),
        cost_estimate=pl.CostEstimate(
            flops=(3 + 3 * int(add_res)) * Mp * Cp,
            transcendentals=0,
            bytes_accessed=(2 + int(add_res)) * Mp * Cp * 2
            + (2 + 2 * int(add_res)) * Cp * 4,
        ),
    )(*args)

    N, Ho, Wo, Cout, M = (meta["N"], meta["Ho"], meta["Wo"], meta["Cout"],
                          meta["M"])
    return y[:M, :Cout].reshape(N, Ho, Wo, Cout)


def _identity_residual(x_nhwc, meta):
    """Identity shortcut packed as a (residual, rscale=1, rshift=0) triple."""
    M, Mp, Cp, Cout = meta["M"], meta["Mp"], meta["Cp"], meta["Cout"]
    r = jnp.pad(x_nhwc.astype(jnp.bfloat16).reshape(M, Cout),
                ((0, Mp - M), (0, Cp - Cout)))
    return (r, jnp.ones((1, Cp), jnp.float32), jnp.zeros((1, Cp), jnp.float32))


# ----------------------------------------------------------------------------
# BasicBlock forward
# ----------------------------------------------------------------------------
def basic_block_forward(x_nchw, params, *, in_planes, planes, stride):
    x = jnp.transpose(x_nchw, (0, 2, 3, 1))  # NCHW -> NHWC

    # conv1 -> bn1 -> relu
    c1, s1, t1, m1 = conv_stats(x, params["w1"], params["g1"], params["b1"],
                                stride=stride)
    o1 = bn_apply(c1, s1, t1, m1, relu=True)            # bf16 NHWC

    # conv2 (stats only; bn2-apply is fused with the shortcut add below)
    c2, s2, t2, m2 = conv_stats(o1, params["w2"], params["g2"], params["b2"],
                                stride=1)

    if stride != 1 or in_planes != planes:
        # projection shortcut: 1x1 conv stats; its BN-apply is fused into the
        # final pass-2 (no separate HBM round trip for the shortcut).
        cs, ss, ts, ms = conv_stats(x, params["ws"], params["gs"], params["bs"],
                                    stride=stride)
        assert (ms["Mp"], ms["Cp"], ms["tile_m"]) == \
               (m2["Mp"], m2["Cp"], m2["tile_m"])
        residual = (cs, ss, ts)
    else:
        residual = _identity_residual(x, m2)

    # bn2(conv2) + bn_sc(shortcut) -> relu, all in one tiled pass
    out = bn_apply(c2, s2, t2, m2, relu=True, residual=residual)

    return jnp.transpose(out, (0, 3, 1, 2)).astype(jnp.float32)  # NHWC -> NCHW


# ----------------------------------------------------------------------------
# Deterministic parameter init (synthetic)
# ----------------------------------------------------------------------------
def init_params(key, in_planes, planes, stride):
    ks = jax.random.split(key, 10)
    p = {
        "w1": 0.1 * jax.random.normal(ks[0], (planes, in_planes, 3, 3), jnp.float32),
        "g1": 1.0 + 0.1 * jax.random.normal(ks[1], (planes,), jnp.float32),
        "b1": 0.1 * jax.random.normal(ks[2], (planes,), jnp.float32),
        "w2": 0.1 * jax.random.normal(ks[3], (planes, planes, 3, 3), jnp.float32),
        "g2": 1.0 + 0.1 * jax.random.normal(ks[4], (planes,), jnp.float32),
        "b2": 0.1 * jax.random.normal(ks[5], (planes,), jnp.float32),
    }
    if stride != 1 or in_planes != planes:
        p["ws"] = 0.1 * jax.random.normal(ks[6], (planes, in_planes, 1, 1), jnp.float32)
        p["gs"] = 1.0 + 0.1 * jax.random.normal(ks[7], (planes,), jnp.float32)
        p["bs"] = 0.1 * jax.random.normal(ks[8], (planes,), jnp.float32)
    return p


# ----------------------------------------------------------------------------
# Pure-JAX f32 reference (for correctness check)
# ----------------------------------------------------------------------------
def _ref_conv(x_nhwc, w_oikk, stride, pad):
    return jax.lax.conv_general_dilated(
        x_nhwc, jnp.transpose(w_oikk, (2, 3, 1, 0)),
        window_strides=(stride, stride), padding=[(pad, pad), (pad, pad)],
        dimension_numbers=("NHWC", "HWIO", "NHWC"))


def _ref_bn(x, g, b):
    mean = jnp.mean(x, axis=(0, 1, 2), keepdims=True)
    var = jnp.mean(jnp.square(x - mean), axis=(0, 1, 2), keepdims=True)
    return (x - mean) * jax.lax.rsqrt(var + BN_EPS) * g.reshape(1, 1, 1, -1) \
        + b.reshape(1, 1, 1, -1)


def basic_block_reference(x_nchw, params, *, in_planes, planes, stride):
    x = jnp.transpose(x_nchw, (0, 2, 3, 1))
    o = jax.nn.relu(_ref_bn(_ref_conv(x, params["w1"], stride, 1),
                            params["g1"], params["b1"]))
    o = _ref_bn(_ref_conv(o, params["w2"], 1, 1), params["g2"], params["b2"])
    if stride != 1 or in_planes != planes:
        sc = _ref_bn(_ref_conv(x, params["ws"], stride, 0),
                     params["gs"], params["bs"])
    else:
        sc = x
    o = jax.nn.relu(o + sc)
    return jnp.transpose(o, (0, 3, 1, 2))


# ----------------------------------------------------------------------------
if __name__ == "__main__":
    key = jax.random.PRNGKey(0)

    # Kernel uses bf16 MXU operands / bf16 intermediates (f32 accumulation and
    # f32 BN statistics), so the match against the pure-f32 reference is
    # checked at a bf16-appropriate tolerance.
    TOL = 3e-2

    # case 1: projection shortcut (stride=2, in_planes != planes)
    in_planes, planes, stride = 4, 8, 2
    k_x, k_p, k_p2 = jax.random.split(key, 3)
    x = jax.random.normal(k_x, (2, in_planes, 16, 16), jnp.float32)  # NCHW
    params = init_params(k_p, in_planes, planes, stride)

    out = basic_block_forward(x, params, in_planes=in_planes, planes=planes,
                              stride=stride)
    out = jax.block_until_ready(out)
    ref = basic_block_reference(x, params, in_planes=in_planes, planes=planes,
                                stride=stride)
    assert out.shape == (2, planes, 8, 8), out.shape
    assert jnp.allclose(out, ref, atol=TOL, rtol=TOL), "mismatch (projection)"

    # case 2: identity shortcut (stride=1, in_planes == planes)
    params2 = init_params(k_p2, planes, planes, 1)
    x2 = out  # reuse output as next block's input
    out2 = basic_block_forward(x2, params2, in_planes=planes, planes=planes,
                               stride=1)
    out2 = jax.block_until_ready(out2)
    ref2 = basic_block_reference(x2, params2, in_planes=planes, planes=planes,
                                 stride=1)
    assert out2.shape == (2, planes, 8, 8), out2.shape
    assert jnp.allclose(out2, ref2, atol=TOL, rtol=TOL), "mismatch (identity)"

    print("KERNEL_OK")
</pallas_src>

<mosaic_0001>
module attributes {stable_mosaic.version = 11 : i64} {
  func.func @_conv_stats_kernel(%arg0: i32, %arg1: memref<64x128xbf16, #tpu.memory_space<vmem>>, %arg2: memref<128x128xbf16, #tpu.memory_space<vmem>>, %arg3: memref<64x128xbf16, #tpu.memory_space<vmem>>, %arg4: memref<8x128xf32, #tpu.memory_space<vmem>>) attributes {dimension_semantics = [#tpu.dimension_semantics<parallel>], iteration_bounds = array<i64: 2>, scalar_prefetch = 0 : i64, scratch_operands = 0 : i64, tpu.core_type = #tpu.core_type<tc>, window_params = [{transform_indices = @transform_0, window_bounds = array<i64: 64, 128>}, {pipeline_mode = #tpu.pipeline_mode<synchronous>, transform_indices = @transform_1, window_bounds = array<i64: 128, 128>}, {transform_indices = @transform_2, window_bounds = array<i64: 64, 128>}, {transform_indices = @transform_3, window_bounds = array<i64: 8, 128>}]} {
    %c0 = arith.constant 0 : index
    %c0_0 = arith.constant 0 : index
    %0 = vector.load %arg1[%c0, %c0_0] : memref<64x128xbf16, #tpu.memory_space<vmem>>, vector<64x128xbf16>
    %c0_1 = arith.constant 0 : index
    %c0_2 = arith.constant 0 : index
    %1 = vector.load %arg2[%c0_1, %c0_2] : memref<128x128xbf16, #tpu.memory_space<vmem>>, vector<128x128xbf16>
    %cst = arith.constant dense<0.000000e+00> : vector<64x128xf32>
    %2 = tpu.matmul %0, %1, %cst {dimension_numbers = #tpu.dot_dimension_numbers<[1], [0], [0], [1], [0, 0, 1, 1], [], []>} : vector<64x128xbf16>, vector<128x128xbf16>, vector<64x128xf32> -> vector<64x128xf32>
    %cst_3 = arith.constant 0.000000e+00 : f32
    %3 = vector.broadcast %cst_3 : f32 to vector<8x128xf32>
    %c0_4 = arith.constant 0 : index
    %c0_5 = arith.constant 0 : index
    %4 = vector.load %arg4[%c0_4, %c0_5] : memref<8x128xf32, #tpu.memory_space<vmem>>, vector<8x128xf32>
    tpu.vector_store %arg4[%c0_4, %c0_5], %3 {strides = array<i32>} : memref<8x128xf32, #tpu.memory_space<vmem>>, vector<8x128xf32>,
    %cst_6 = arith.constant dense<0.000000e+00> : vector<128xf32>
    %5 = vector.multi_reduction <add>, %2, %cst_6 [0] : vector<64x128xf32> to vector<128xf32>
    %6 = vector.shape_cast %5 : vector<128xf32> to vector<1x128xf32>
    %c0_7 = arith.constant 0 : index
    %c0_8 = arith.constant 0 : index
    %7 = vector.load %arg4[%c0_7, %c0_8] : memref<8x128xf32, #tpu.memory_space<vmem>>, vector<1x128xf32>
    tpu.vector_store %arg4[%c0_7, %c0_8], %6 {strides = array<i32>} : memref<8x128xf32, #tpu.memory_space<vmem>>, vector<1x128xf32>,
    %8 = arith.mulf %2, %2 : vector<64x128xf32>
    %cst_9 = arith.constant dense<0.000000e+00> : vector<128xf32>
    %9 = vector.multi_reduction <add>, %8, %cst_9 [0] : vector<64x128xf32> to vector<128xf32>
    %10 = vector.shape_cast %9 : vector<128xf32> to vector<1x128xf32>
    %c1 = arith.constant 1 : index
    %c0_10 = arith.constant 0 : index
    %11 = vector.load %arg4[%c1, %c0_10] : memref<8x128xf32, #tpu.memory_space<vmem>>, vector<1x128xf32>
    tpu.vector_store %arg4[%c1, %c0_10], %10 {strides = array<i32>} : memref<8x128xf32, #tpu.memory_space<vmem>>, vector<1x128xf32>,
    %12 = arith.truncf %2 : vector<64x128xf32> to vector<64x128xbf16>
    %c0_11 = arith.constant 0 : index
    %c0_12 = arith.constant 0 : index
    %13 = vector.load %arg3[%c0_11, %c0_12] : memref<64x128xbf16, #tpu.memory_space<vmem>>, vector<64x128xbf16>
    tpu.vector_store %arg3[%c0_11, %c0_12], %12 {strides = array<i32>} : memref<64x128xbf16, #tpu.memory_space<vmem>>, vector<64x128xbf16>,
    return
  }
  func.func @transform_0(%arg0: i32) -> (i32, i32) {
    %c0_i32 = arith.constant 0 : i32
    %c0_i32_0 = arith.constant 0 : i32
    return %arg0, %c0_i32 : i32, i32
  }
  func.func @transform_1(%arg0: i32) -> (i32, i32) {
    %c0_i32 = arith.constant 0 : i32
    %c0_i32_0 = arith.constant 0 : i32
    %c0_i32_1 = arith.constant 0 : i32
    return %c0_i32, %c0_i32_0 : i32, i32
  }
  func.func @transform_2(%arg0: i32) -> (i32, i32) {
    %c0_i32 = arith.constant 0 : i32
    %c0_i32_0 = arith.constant 0 : i32
    return %arg0, %c0_i32 : i32, i32
  }
  func.func @transform_3(%arg0: i32) -> (i32, i32) {
    %c0_i32 = arith.constant 0 : i32
    %c0_i32_0 = arith.constant 0 : i32
    return %arg0, %c0_i32 : i32, i32
  }
}

</mosaic_0001>

<bundles_post_ra>
// kernel: tpu_custom_call.1
= control target key start
LH: loop header
LB: loop body
LE: loop exit
PB: predicated region body
PF: predicated region fallthrough
CT: control target
= control target key end

     0   :  { %9 = vsyncpa [#allocation3], 0  ;;  %s1114_s0 = inlined_call_operand.hbm [shape: bf16[128,128], index: 0, kind: input, shape index: {}]   ;;  %s1115_s1 = inlined_call_operand.hbm [shape: bf16[128,128], index: 1, kind: input, shape index: {}]   ;;  %s1116_s2 = inlined_call_operand.hbm [shape: bf16[128,128], index: 2, kind: output, shape index: {0}]   ;;  %s1117_s3 = inlined_call_operand.hbm [shape: f32[16,128], index: 3, kind: output, shape index: {1}]  }
   0x1   :  { %11 = vsyncpa [#allocation3 + $0x1], 0 }
   0x2   :  { %12 = vsyncpa [#allocation6], 0 }
   0x3   :  { %13 = vsyncpa [#allocation4], 0 }
   0x4   :  { %15 = vsyncpa [#allocation4 + $0x1], 0 }
   0x5   :  { %16 = vsyncpa [#allocation9], 0 }
   0x6   :  { %18 = vsyncpa [#allocation9 + $0x1], 0  ;;  %s935_s12 = smov 0   ;;  %s937_s13 = smov 0  }
   0x7   :  { %s939_s14 = smov 0   ;;  %s941_s15 = smov 0  }
   0x8 LB: > { %s956_s16 = sadd.s32 4294967295, %s907_s15   ;;  %s550_s17 = sadd.s32 4294967294, %s907_s15   ;;  %s907_s15 = sphi %s941_s15, %s1127_s15   ;;  %s903_s14 = sphi %s939_s14, %s1126_s14   ;;  %s899_s13 = sphi %s937_s13, %s1125_s13   ;;  %s895_s12 = sphi %s935_s12, %s1124_s12  }
   0x9   : > { %p44_p0 = scmp.ne.s32.totalorder %s899_s13, %s895_s12  ;;  %p45_p1 = scmp.eq.s32.totalorder %s956_s16, 0 }
   0xa   : > { %p89_p2 = scmp.eq.s32.totalorder %s956_s16, 1  ;;  %p95_p3 = scmp.eq.s32.totalorder %s550_s17, 1 }
   0xb   : > { %p965_p4 = por %p45_p1, %p44_p0  ;;  %p551_p5 = scmp.ge.s32.totalorder %s907_s15, 1 }
   0xc   : > { %p970_p6 = por %p95_p3, %p44_p0  ;;  %p128_p7 = scmp.lt.s32.totalorder %s907_s15, 3 }
   0xd   : > { %s139_s22 = sshll.u32 %s1115_s1, 4  ;;  %s909_s24 = smov [#allocation5]   ;;  %s140_s22 = int_to_ptr.hbm [resolvable:$true] %s139_s22 }
   0xe   : > { %p978_p8 = pnand %p551_p5, %p128_p7  ;;  %s141_s25 = sshll.u32 %s909_s24, 4  ;;  %s142_s25 = int_to_ptr.vmem [resolvable:$true] %s141_s25 }
   0xf   : > { %s988_s26 = sadd.s32 1, %s907_s15   ;;  %s910_s27 = smov 64  }
  0x10   : > { %p688_p9 = pneg %p978_p8  ;;  %s911_s28 = smov 4  }
  0x11   : > { %s28_s29 = ssub.s32 %s907_s15, %s988_s26  ;;  %s31_s30 = sadd.s32 1, %s903_s14 }
  0x12   : > { %p689_p10 = pnand %p688_p9, %p45_p1  ;;  %p29_p12 = scmp.eq.s32.totalorder %s28_s29, 0 }
  0x13   : > { %p38_p13 = scmp.ne.s32.totalorder %s903_s14, %s899_s13  ;;  %p39_p0 = scmp.eq.s32.totalorder %s907_s15, 0 }
  0x14   : > { %691 = dma.hbm_to_vmem [thread:$0]  (!%p689_p10), %s140_s22, 1024, %s142_s25, [#allocation6], %s910_s27, %s910_s27, %s911_s28  }
  0x15   : > { %s1000_s4 = scalar_select %p29_p12, %s903_s14, %s31_s30  }
  0x16   : > { %p1004_p3 = por %p89_p2, %p38_p13  ;;  %p704_p5 = scmp.lt.s32.totalorder %s907_s15, 2 }
  0x17   : > { %s155_s6 = sand.u32 1, %s903_s14   ;;  %s617_s7 = sshll.u32 %s907_s15, 5 }
  0x18   : > { %p40_p7 = por %p39_p0, %p38_p13  ;;  %s554_s8 = sshll.u32 %s155_s6, 5 }
  0x19   : > { %s164_s11 = scalar_lea.hbm %s1114_s0, %s617_s7  ;;  %s159_s20 = scalar_lea.vmem [#allocation2], %s554_s8 }
  0x1a   : > { %s165_s17 = sshll.u32 %s164_s11, 4  ;;  %s167_s21 = sshll.u32 %s159_s20, 4  ;;  %s166_s17 = int_to_ptr.hbm [resolvable:$true] %s165_s17  ;;  %s168_s21 = int_to_ptr.vmem [resolvable:$true] %s167_s21 }
  0x1b   : > { %p1014_p9 = pnand %p704_p5, %p40_p7  ;;  %s156_s24 = scalar_lea.sflag [#allocation3], %s155_s6 }
  0x1c   : > { %s775_s25 = sshra.s32 %s166_s17, 4  ;;  %s782_s8 = scalar_lea.hbm %s1114_s0, 64  ;;  %s776_s25 = int_to_ptr.hbm [resolvable:$true] %s775_s25 }
  0x1d   : > { %s777_s29 = scalar_lea.hbm %s776_s25, 32  ;;  %p779_p10 = pneg %p1014_p9 }
  0x1e   : > { %p778_p2 = scmp.ne.s32.totalorder %s776_s25, %s777_s29  ;;  %p783_p0 = scmp.lt.s32.totalorder %s776_s25, %s1114_s0 }
  0x1f   : > { %p784_p5 = scmp.lt.s32.totalorder %s782_s8, %s777_s29 }
  0x20   : > { %p780_p12 = pnand %p779_p10, %p778_p2 }
  0x21   : > { %p785_p7 = por %p784_p5, %p783_p0 }
  0x22   : > { %p781_p13 = pneg %p780_p12 }
  0x24   : > { %p786_p11 = pnand %p785_p7, %p781_p13 }
  0x26   : > { %789 = shalt.err (!%p786_p11)
}
  0x27   : > { %695 = dma.hbm_to_vmem [thread:$0]  (!%p1014_p9), %s166_s17, 512, %s168_s21, %s156_s24, %s910_s27, %s910_s27, %s911_s28  }
  0x28   : > { %179 = sbr.rel (%p978_p8) target bundleno = 245 (0xf5), region = 28  ;;  %s1034_s6 = sand.u32 (!%p978_p8), 1, %s899_s13  }
  0x29   : > { %s558_s11 = sshll.u32 (!%p978_p8), %s1034_s6, 5  ;;  %s182_s20 = scalar_lea.sflag (!%p978_p8), [#allocation3], %s1034_s6 }
  0x2a   : > { %s1040_s25 = scalar_lea.vmem (!%p978_p8), [#allocation2], %s558_s11 }
  0x2d   : > { %878 = dma.done.wait (%p965_p4), %s182_s20, 512  }
  0x2e   : > { %880 = vsyncadd (%p965_p4), %s182_s20, 4294966784 }
  0x2f   : > { %882 = dma.done.wait (%p45_p1), [#allocation6], 1024  }
  0x30   : > { %884 = vsyncadd (%p45_p1), [#allocation6], 4294966272  ;;  %v629_v0 = vld [vmem:[#allocation5 + $0x38] sm:$0xff]  ;;  %v628_v1 = vld [vmem:[#allocation5 + $0x30] sm:$0xff]  ;;  %s561_s18 = sshll.u32 %s1034_s6, 3  ;;  %v912_v14 = vmov 0.0  }
  0x31   : > { %317 = vmatpush.bf16.msra.mxu0 %v629_v0  ;;  %654 = vmatpush.bf16.msra.mxu1 %v629_v0  ;;  %v627_v2 = vld [vmem:[#allocation5 + $0x28] sm:$0xff]  ;;  %v626_v3 = vld [vmem:[#allocation5 + $0x20] sm:$0xff]  ;;  %v625_v4 = vld [vmem:[#allocation5 + $0x18] sm:$0xff]  ;;  %s1055_s23 = scalar_lea.vmem [#allocation8], %s561_s18  ;;  %s630_s27 = sshll.u32 %s956_s16, 5 }
  0x32   : > { %655 = vmatpush.bf16.msra.mxu2 %v629_v0  ;;  %656 = vmatpush.bf16.msra.mxu3 %v629_v0  ;;  %v624_v5 = vld [vmem:[#allocation5 + $0x10] sm:$0xff]  ;;  %v623_v6 = vld [vmem:[#allocation5 + $0x8] sm:$0xff]  ;;  %v622_v7 = vld [vmem:[#allocation5] sm:$0xff]  ;;  %346 = vst [vmem:[%s1055_s23] sm:$0xff] %v912_v14  ;;  %s211_s28 = scalar_lea.vmem [#allocation7], %s558_s11  ;;  %s416_s22 = scalar_lea.hbm %s1116_s2, %s630_s27 }
  0x33   : > { %v618_v8 = vld [vmem:[%s1040_s25] sm:$0xff]  ;;  %v619_v9 = vld [vmem:[%s1040_s25 + $0x8] sm:$0xff]  ;;  %v620_v10 = vld [vmem:[%s1040_s25 + $0x10] sm:$0xff]  ;;  %s417_s24 = sshll.u32 %s211_s28, 4  ;;  %s419_s29 = sshll.u32 %s416_s22, 4  ;;  %s1064_s24 = int_to_ptr.vmem [resolvable:$true] %s417_s24  ;;  %s420_s29 = int_to_ptr.hbm [resolvable:$true] %s419_s29 }
  0x34   : > { %v621_v11 = vld [vmem:[%s1040_s25 + $0x18] sm:$0xff]  ;;  %s400_s30 = scalar_lea.sflag [#allocation4], %s1034_s6  ;;  %s819_s7 = sshra.s32 %s420_s29, 4  ;;  %s820_s7 = int_to_ptr.hbm [resolvable:$true] %s819_s7 }
  0x35   : > { %318 = vmatpush.bf16.msra.mxu0 %v628_v1  ;;  %657 = vmatpush.bf16.msra.mxu1 %v628_v1  ;;  %s821_s8 = scalar_lea.hbm %s820_s7, 32  ;;  %s825_s11 = scalar_lea.hbm %s1116_s2, 64 }
  0x36   : > { %658 = vmatpush.bf16.msra.mxu2 %v628_v1  ;;  %659 = vmatpush.bf16.msra.mxu3 %v628_v1  ;;  %p822_p1 = scmp.ne.s32.totalorder %s820_s7, %s821_s8  ;;  %p826_p11 = scmp.lt.s32.totalorder %s820_s7, %s1116_s2 }
  0x37   : > { %p827_p9 = scmp.lt.s32.totalorder %s825_s11, %s821_s8 }
  0x38   : > { %p823_p4 = pnand %p822_p1, %p1004_p3 }
  0x39   : > { %319 = vmatpush.bf16.msra.mxu0 %v627_v2  ;;  %660 = vmatpush.bf16.msra.mxu1 %v627_v2  ;;  %p828_p2 = por %p827_p9, %p826_p11 }
  0x3a   : > { %661 = vmatpush.bf16.msra.mxu2 %v627_v2  ;;  %662 = vmatpush.bf16.msra.mxu3 %v627_v2  ;;  %p824_p8 = pneg %p823_p4 }
  0x3c   : > { %p829_p10 = pnand %p828_p2, %p824_p8 }
  0x3d   : > { %320 = vmatpush.bf16.msra.mxu0 %v626_v3  ;;  %663 = vmatpush.bf16.msra.mxu1 %v626_v3 }
  0x3e   : > { %664 = vmatpush.bf16.msra.mxu2 %v626_v3  ;;  %665 = vmatpush.bf16.msra.mxu3 %v626_v3 }
  0x41   : > { %321 = vmatpush.bf16.msra.mxu0 %v625_v4  ;;  %666 = vmatpush.bf16.msra.mxu1 %v625_v4 }
  0x42   : > { %667 = vmatpush.bf16.msra.mxu2 %v625_v4  ;;  %668 = vmatpush.bf16.msra.mxu3 %v625_v4 }
  0x45   : > { %322 = vmatpush.bf16.msra.mxu0 %v624_v5  ;;  %669 = vmatpush.bf16.msra.mxu1 %v624_v5 }
  0x46   : > { %670 = vmatpush.bf16.msra.mxu2 %v624_v5  ;;  %671 = vmatpush.bf16.msra.mxu3 %v624_v5 }
  0x49   : > { %323 = vmatpush.bf16.msra.mxu0 %v623_v6  ;;  %672 = vmatpush.bf16.msra.mxu1 %v623_v6 }
  0x4a   : > { %673 = vmatpush.bf16.msra.mxu2 %v623_v6  ;;  %674 = vmatpush.bf16.msra.mxu3 %v623_v6 }
  0x4d   : > { %324 = vmatpush.bf16.msra.mxu0 %v622_v7  ;;  %675 = vmatpush.bf16.msra.mxu1 %v622_v7 }
  0x4e   : > { %676 = vmatpush.bf16.msra.mxu2 %v622_v7  ;;  %677 = vmatpush.bf16.msra.mxu3 %v622_v7 }
  0x50   : > { %325 = vmatmul.bf16.vlgmr.msra.gmra.mxu0 %v618_v8  ;;  %330 = vmatmul.bf16.vlgmr.msra.gmra.mxu1 %v619_v9 }
  0x51   : > { %335 = vmatmul.bf16.vlgmr.msra.gmra.mxu2 %v620_v10  ;;  %340 = vmatmul.bf16.vlgmr.msra.gmra.mxu3 %v621_v11 }
  0xcd   : > { %v326_v12 = vpop.f32.mrf.mxu0  ;;  %v331_v13 = vpop.f32.mrf.mxu1 }
  0xce   : > { %v361_v19 = vmul.f32 %v326_v12, %v326_v12  ;;  %v363_v24 = vmul.f32 %v331_v13, %v331_v13 }
  0xd4   : > { %v336_v15 = vpop.f32.mrf.mxu2  ;;  %v341_v16 = vpop.f32.mrf.mxu3 }
  0xd5   : > { %v328_v17 = vpop.f32.mrf.mxu0  ;;  %v333_v18 = vpop.f32.mrf.mxu1  ;;  %v365_v30 = vmul.f32 %v336_v15, %v336_v15  ;;  %v367_v40 = vmul.f32 %v341_v16, %v341_v16 }
  0xd6   : > { %v347_v20 = vadd.f32 %v328_v17, %v326_v12  ;;  %v362_v21 = vmul.f32 %v328_v17, %v328_v17  ;;  %v634_v22 = vpack.c.bf16 %v328_v17, %v326_v12  ;;  %v639_v23 = vpack.c.bf16 %v333_v18, %v331_v13 }
  0xd7   : > { %v364_v28 = vmul.f32 %v333_v18, %v333_v18 }
  0xd8   : > { %v369_v25 = vadd.f32 %v362_v21, %v361_v19  ;;  %635 = vst [vmem:[%s211_s28] sm:$0xff] %v634_v22   ;;  %v348_v26 = vadd.f32 %v347_v20, %v331_v13 }
  0xd9   : > { %651 = vst [vmem:[%s211_s28 + $0x8] sm:$0xff] %v639_v23  }
  0xda   : > { %v349_v27 = vadd.f32 %v348_v26, %v333_v18  ;;  %v370_v29 = vadd.f32 %v369_v25, %v363_v24 }
  0xdc   : > { %v371_v31 = vadd.f32 %v370_v29, %v364_v28  ;;  %v338_v32 = vpop.f32.mrf.mxu2  ;;  %v350_v33 = vadd.f32 %v349_v27, %v336_v15  ;;  %v343_v34 = vpop.f32.mrf.mxu3 }
  0xdd   : > { %v644_v35 = vpack.c.bf16 %v338_v32, %v336_v15  ;;  %v649_v36 = vpack.c.bf16 %v343_v34, %v341_v16  ;;  %v366_v38 = vmul.f32 %v338_v32, %v338_v32 }
  0xde   : > { %v351_v37 = vadd.f32 %v350_v33, %v338_v32  ;;  %v372_v39 = vadd.f32 %v371_v31, %v365_v30 }
  0xdf   : > { %652 = vst [vmem:[%s211_s28 + $0x10] sm:$0xff] %v644_v35  }
  0xe0   : > { %v373_v41 = vadd.f32 %v372_v39, %v366_v38  ;;  %v352_v42 = vadd.f32 %v351_v37, %v341_v16  ;;  %653 = vst [vmem:[%s211_s28 + $0x18] sm:$0xff] %v649_v36  }
  0xe1   : > { %832 = shalt.err (!%p829_p10)
}
  0xe2   : > { %s913_s18 = smov 64   ;;  %s914_s27 = smov 4   ;;  %v353_v43 = vadd.f32 %v352_v42, %v343_v34  ;;  %v368_v44 = vmul.f32 %v343_v34, %v343_v34  ;;  %v374_v45 = vadd.f32 %v373_v41, %v367_v40 }
  0xe3   : > { %684 = dma.vmem_to_hbm [thread:$0]  (%p1004_p3), %s1064_s24, 512, %s420_s29, %s400_s30, %s913_s18, %s913_s18, %s914_s27  }
  0xe4   : > { %v354_v46 = vrot.slane %v353_v43, 4  ;;  %v375_v47 = vadd.f32 %v374_v45, %v368_v44  ;;  %s614_s28 = sshll.u32 %s956_s16, 3  ;;  %s434_s24 = sshll.u32 %s1055_s23, 4  ;;  %s435_s24 = int_to_ptr.vmem [resolvable:$true] %s434_s24 }
  0xe5   : > { %s432_s22 = scalar_lea.hbm %s1117_s3, %s614_s28  ;;  %s405_s16 = scalar_lea.sflag [#allocation9], %s1034_s6 }
  0xe6   : > { %v355_v48 = vadd.f32 %v354_v46, %v353_v43  ;;  %v376_v49 = vrot.slane %v375_v47, 4  ;;  %s436_s29 = sshll.u32 %s432_s22, 4  ;;  %s853_s10 = scalar_lea.hbm %s1117_s3, 16  ;;  %s437_s29 = int_to_ptr.hbm [resolvable:$true] %s436_s29 }
  0xe7   : > { %s847_s30 = sshra.s32 %s437_s29, 4  ;;  %s848_s30 = int_to_ptr.hbm [resolvable:$true] %s847_s30 }
  0xe8   : > { %v356_v50 = vrot.slane %v355_v48, 2  ;;  %v377_v51 = vadd.f32 %v376_v49, %v375_v47  ;;  %s849_s7 = scalar_lea.hbm %s848_s30, 8  ;;  %p854_p5 = scmp.lt.s32.totalorder %s848_s30, %s1117_s3 }
  0xe9   : > { %p850_p12 = scmp.ne.s32.totalorder %s848_s30, %s849_s7  ;;  %p855_p7 = scmp.lt.s32.totalorder %s853_s10, %s849_s7 }
  0xea   : > { %v357_v52 = vadd.f32 %v356_v50, %v355_v48  ;;  %v378_v53 = vrot.slane %v377_v51, 2 }
  0xeb   : > { %p851_p13 = pnand %p850_p12, %p1004_p3  ;;  %p856_p1 = por %p855_p7, %p854_p5 }
  0xec   : > { %v358_v54 = vrot.slane %v357_v52, 1  ;;  %v379_v55 = vadd.f32 %v378_v53, %v377_v51 }
  0xed   : > { %p852_p0 = pneg %p851_p13 }
  0xee   : > { %v359_v56 = vadd.f32 %v358_v54, %v357_v52  ;;  %v380_v57 = vrot.slane %v379_v55, 1 }
  0xef   : > { %p857_p4 = pnand %p856_p1, %p852_p0 }
  0xf0   : > { %v381_v58 = vadd.f32 %v380_v57, %v379_v55  ;;  %360 = vst [vmem:[%s1055_s23] sm:$0x1] %v359_v56 }
  0xf2   : > { %382 = vst [vmem:[%s1055_s23 + $0x1] sm:$0x1] %v381_v58 }
  0xf3   : > { %860 = shalt.err (!%p857_p4)
}
  0xf4   : > { %685 = dma.vmem_to_hbm [thread:$0]  (%p1004_p3), %s435_s24, 128, %s437_s29, %s405_s16  }
  0xf5 PF: > { %s448_s6 = sand.u32 1, %s895_s12   ;;  %p1123_p8 = scmp.ge.s32.totalorder %s907_s15, 2 }
  0xf6   : > { %s449_s23 = scalar_lea.sflag [#allocation4], %s448_s6 }
  0xf7   : > { %p697_p11 = pnand %p1123_p8, %p970_p6 }
  0xf9   : > { %p698_p9 = pneg %p697_p11 }
  0xfb   : > { %886 = dma.done.wait (%p698_p9), %s449_s23, 512  }
  0xfc   : > { %888 = vsyncadd (%p698_p9), %s449_s23, 4294966784  ;;  %s459_s25 = scalar_lea.sflag [#allocation9], %s448_s6 }
  0xfd   : > { %890 = dma.done.wait (%p698_p9), %s459_s25, 128  }
  0xfe   : > { %892 = vsyncadd (%p698_p9), %s459_s25, 4294967168  ;;  %p21_p3 = scmp.ge.s32.totalorder %s988_s26, 4   ;;  %s1124_s12 = smov %s899_s13 }
  0xff   : > { %s1125_s13 = smov %s903_s14  ;;  %s1126_s14 = smov %s1000_s4 }
 0x100   : > { %s1127_s15 = smov %s988_s26  ;;  %23 = sbr.rel (!%p21_p3) target bundleno = 8 (0x8), region = 94 }
 0x105   :  { %465 = vsyncpa [#allocation3], 1 }
 0x106   :  { %467 = vsyncpa [#allocation3 + $0x1], 1 }
 0x107   :  { %468 = vsyncpa [#allocation6], 1 }
 0x108   :  { %469 = vsyncpa [#allocation4], 1 }
 0x109   :  { %471 = vsyncpa [#allocation4 + $0x1], 1 }
 0x10a   :  { %472 = vsyncpa [#allocation9], 1 }
 0x10b   :  { %474 = vsyncpa [#allocation9 + $0x1], 1 }

</bundles_post_ra>
